<compile_context>
chip_gen: v6e
topology: v6e:2x2x1
jax: 0.10.0
libtpu: 0.0.40
codegen_flags: <defaults>
</compile_context>

<pallas_src>
import jax
import jax.numpy as jnp
from jax.experimental import pallas as pl
from jax.experimental.pallas import tpu as pltpu

LANE = 128


# ---------------------------------------------------------------------------
# Fused Pallas kernel: conv1 -> relu -> (dropout=id) -> conv2 -> log_softmax
# ---------------------------------------------------------------------------
def _gcn_net_fused_kernel(a_ref, x_ref, w1_ref, b1_ref, w2p_ref, b2p_ref, o_ref):
    a = a_ref[...]                                                     # (N, N)

    # ---- GCNConv 1: "linear" (X@W1), "message+aggregate" (A@.), "update" (+b) ----
    xw1 = jnp.dot(x_ref[...], w1_ref[...], preferred_element_type=jnp.float32)
    h = jnp.dot(a, xw1, preferred_element_type=jnp.float32) + b1_ref[...]
    h = jnp.maximum(h, 0.0)                                            # ReLU
    # F.dropout(x, training=False) is the identity at inference.

    # ---- GCNConv 2 on class-dim-padded weights (lane-dense output path) ----
    hw2 = jnp.dot(h, w2p_ref[...], preferred_element_type=jnp.float32)
    logits = jnp.dot(a, hw2, preferred_element_type=jnp.float32) + b2p_ref[...]

    # Padded class lanes carry a ~-1e30 bias -> exp() == 0, never win the max,
    # so the log-softmax over all 128 lanes equals the log-softmax over the
    # real classes.  Whole [N, 128] result is one unmasked store.
    m = jnp.max(logits, axis=1, keepdims=True)
    z = logits - m
    lse = jnp.log(jnp.sum(jnp.exp(z), axis=1, keepdims=True))
    o_ref[...] = (z - lse).astype(o_ref.dtype)


# ---------------------------------------------------------------------------
# Wrapper
# ---------------------------------------------------------------------------
def gcn_net_forward(params, x, a_hat):
    """Mirrors GCNNet.forward(data) with data = (x, adj_t), eval mode."""
    n, f_in = x.shape
    hidden = params["w1"].shape[1]
    num_classes = params["w2"].shape[1]

    # Pad the class dim to a full multiple of 128 lanes: zero weight columns and a
    # huge negative bias make the padded logits inert under log-softmax.
    c_pad = ((num_classes + LANE - 1) // LANE) * LANE
    pad = c_pad - num_classes
    w2p = jnp.pad(params["w2"], ((0, 0), (0, pad)))
    b2p = jnp.pad(params["b2"], ((0, 0), (0, pad)), constant_values=-1e30)

    out_padded = pl.pallas_call(
        _gcn_net_fused_kernel,
        out_shape=jax.ShapeDtypeStruct((n, c_pad), jnp.float32),
        grid=(1,),  # whole problem in one step: everything stays VMEM-resident
        in_specs=[
            pl.BlockSpec((n, n), lambda i: (0, 0)),          # A_hat
            pl.BlockSpec((n, f_in), lambda i: (0, 0)),       # X
            pl.BlockSpec((f_in, hidden), lambda i: (0, 0)),  # W1
            pl.BlockSpec((1, hidden), lambda i: (0, 0)),     # b1
            pl.BlockSpec((hidden, c_pad), lambda i: (0, 0)), # W2 (class-padded)
            pl.BlockSpec((1, c_pad), lambda i: (0, 0)),      # b2 (class-padded)
        ],
        out_specs=pl.BlockSpec((n, c_pad), lambda i: (0, 0)),
        compiler_params=pltpu.CompilerParams(
            dimension_semantics=("arbitrary",),
        ),
    )(a_hat, x, params["w1"], params["b1"], w2p, b2p)

    out = out_padded[:, :num_classes]
    # The PyTorch forward also returns accumulated per-phase timings; return zeros.
    zero = jnp.float32(0.0)
    return out, zero, zero, zero, zero


# ---------------------------------------------------------------------------
# Deterministic setup + run
# ---------------------------------------------------------------------------
def _glorot(key, shape):
    fan_in, fan_out = shape
    lim = jnp.sqrt(6.0 / (fan_in + fan_out))
    return jax.random.uniform(key, shape, jnp.float32, -lim, lim)


if __name__ == "__main__":
    N = 128            # number of nodes
    F_IN = 32          # num_node_features
    HIDDEN = 16        # hidden_dim
    NUM_CLASSES = 8    # num_classes

    root = jax.random.PRNGKey(0)
    k_x, k_adj, k_w1, k_w2 = jax.random.split(root, 4)

    # Node features.
    x = jax.random.normal(k_x, (N, F_IN), jnp.float32)

    # Random symmetric adjacency with self loops -> GCN-normalized dense A_hat.
    a_rand = jax.random.uniform(k_adj, (N, N)) < 0.05
    a_sym = jnp.logical_or(a_rand, a_rand.T).astype(jnp.float32)
    a_sl = jnp.minimum(a_sym + jnp.eye(N, dtype=jnp.float32), 1.0)
    deg = jnp.sum(a_sl, axis=1)
    d_inv_sqrt = 1.0 / jnp.sqrt(deg)
    a_hat = a_sl * d_inv_sqrt[:, None] * d_inv_sqrt[None, :]

    # GCNConv weights (glorot) and zero biases.
    params = {
        "w1": _glorot(k_w1, (F_IN, HIDDEN)),
        "b1": jnp.zeros((1, HIDDEN), jnp.float32),
        "w2": _glorot(k_w2, (HIDDEN, NUM_CLASSES)),
        "b2": jnp.zeros((1, NUM_CLASSES), jnp.float32),
    }

    fwd = jax.jit(gcn_net_forward)
    out, lin_t, mes_t, aggr_t, up_t = fwd(params, x, a_hat)
    out = jax.block_until_ready(out)

    # Pure-JAX reference check.
    h_ref = jnp.maximum(a_hat @ (x @ params["w1"]) + params["b1"], 0.0)
    logits_ref = a_hat @ (h_ref @ params["w2"]) + params["b2"]
    ref = jax.nn.log_softmax(logits_ref, axis=1)
    assert out.shape == (N, NUM_CLASSES)
    assert jnp.allclose(out, ref, atol=1e-4, rtol=1e-4)

    print("KERNEL_OK")
</pallas_src>

<mosaic_0001>
module attributes {stable_mosaic.version = 11 : i64} {
  func.func @_gcn_net_fused_kernel(%arg0: i32, %arg1: memref<128x128xf32, #tpu.memory_space<vmem>>, %arg2: memref<128x32xf32, #tpu.memory_space<vmem>>, %arg3: memref<32x16xf32, #tpu.memory_space<vmem>>, %arg4: memref<1x16xf32, #tpu.memory_space<vmem>>, %arg5: memref<16x128xf32, #tpu.memory_space<vmem>>, %arg6: memref<1x128xf32, #tpu.memory_space<vmem>>, %arg7: memref<128x128xf32, #tpu.memory_space<vmem>>) attributes {dimension_semantics = [#tpu.dimension_semantics<arbitrary>], iteration_bounds = array<i64: 1>, scalar_prefetch = 0 : i64, scratch_operands = 0 : i64, tpu.core_type = #tpu.core_type<tc>, window_params = [{pipeline_mode = #tpu.pipeline_mode<synchronous>, transform_indices = @transform_0, window_bounds = array<i64: 128, 128>}, {pipeline_mode = #tpu.pipeline_mode<synchronous>, transform_indices = @transform_1, window_bounds = array<i64: 128, 32>}, {pipeline_mode = #tpu.pipeline_mode<synchronous>, transform_indices = @transform_2, window_bounds = array<i64: 32, 16>}, {pipeline_mode = #tpu.pipeline_mode<synchronous>, transform_indices = @transform_3, window_bounds = array<i64: 1, 16>}, {pipeline_mode = #tpu.pipeline_mode<synchronous>, transform_indices = @transform_4, window_bounds = array<i64: 16, 128>}, {pipeline_mode = #tpu.pipeline_mode<synchronous>, transform_indices = @transform_5, window_bounds = array<i64: 1, 128>}, {pipeline_mode = #tpu.pipeline_mode<synchronous>, transform_indices = @transform_6, window_bounds = array<i64: 128, 128>}]} {
    %c0 = arith.constant 0 : index
    %c0_0 = arith.constant 0 : index
    %0 = vector.load %arg1[%c0, %c0_0] : memref<128x128xf32, #tpu.memory_space<vmem>>, vector<128x128xf32>
    %c0_1 = arith.constant 0 : index
    %c0_2 = arith.constant 0 : index
    %1 = vector.load %arg2[%c0_1, %c0_2] : memref<128x32xf32, #tpu.memory_space<vmem>>, vector<128x32xf32>
    %c0_3 = arith.constant 0 : index
    %c0_4 = arith.constant 0 : index
    %2 = vector.load %arg3[%c0_3, %c0_4] : memref<32x16xf32, #tpu.memory_space<vmem>>, vector<32x16xf32>
    %cst = arith.constant dense<0.000000e+00> : vector<128x16xf32>
    %3 = tpu.matmul %1, %2, %cst {dimension_numbers = #tpu.dot_dimension_numbers<[1], [0], [0], [1], [0, 0, 1, 1], [], []>} : vector<128x32xf32>, vector<32x16xf32>, vector<128x16xf32> -> vector<128x16xf32>
    %cst_5 = arith.constant dense<0.000000e+00> : vector<128x16xf32>
    %4 = tpu.matmul %0, %3, %cst_5 {dimension_numbers = #tpu.dot_dimension_numbers<[1], [0], [0], [1], [0, 0, 1, 1], [], []>} : vector<128x128xf32>, vector<128x16xf32>, vector<128x16xf32> -> vector<128x16xf32>
    %c0_6 = arith.constant 0 : index
    %c0_7 = arith.constant 0 : index
    %5 = vector.load %arg4[%c0_6, %c0_7] : memref<1x16xf32, #tpu.memory_space<vmem>>, vector<1x16xf32>
    %6 = vector.broadcast %5 : vector<1x16xf32> to vector<128x16xf32>
    %7 = arith.addf %4, %6 : vector<128x16xf32>
    %cst_8 = arith.constant 0.000000e+00 : f32
    %8 = vector.broadcast %cst_8 : f32 to vector<128x16xf32>
    %9 = arith.maximumf %7, %8 : vector<128x16xf32>
    %c0_9 = arith.constant 0 : index
    %c0_10 = arith.constant 0 : index
    %10 = vector.load %arg5[%c0_9, %c0_10] : memref<16x128xf32, #tpu.memory_space<vmem>>, vector<16x128xf32>
    %cst_11 = arith.constant dense<0.000000e+00> : vector<128x128xf32>
    %11 = tpu.matmul %9, %10, %cst_11 {dimension_numbers = #tpu.dot_dimension_numbers<[1], [0], [0], [1], [0, 0, 1, 1], [], []>} : vector<128x16xf32>, vector<16x128xf32>, vector<128x128xf32> -> vector<128x128xf32>
    %cst_12 = arith.constant dense<0.000000e+00> : vector<128x128xf32>
    %12 = tpu.matmul %0, %11, %cst_12 {dimension_numbers = #tpu.dot_dimension_numbers<[1], [0], [0], [1], [0, 0, 1, 1], [], []>} : vector<128x128xf32>, vector<128x128xf32>, vector<128x128xf32> -> vector<128x128xf32>
    %c0_13 = arith.constant 0 : index
    %c0_14 = arith.constant 0 : index
    %13 = vector.load %arg6[%c0_13, %c0_14] : memref<1x128xf32, #tpu.memory_space<vmem>>, vector<1x128xf32>
    %14 = vector.broadcast %13 : vector<1x128xf32> to vector<128x128xf32>
    %15 = arith.addf %12, %14 : vector<128x128xf32>
    %cst_15 = arith.constant dense<0xFF800000> : vector<128xf32>
    %16 = vector.multi_reduction <maximumf>, %15, %cst_15 [1] : vector<128x128xf32> to vector<128xf32>
    %17 = vector.shape_cast %16 : vector<128xf32> to vector<128x1xf32>
    %18 = vector.broadcast %17 : vector<128x1xf32> to vector<128x128xf32>
    %19 = arith.subf %15, %18 : vector<128x128xf32>
    %20 = math.exp %19 : vector<128x128xf32>
    %cst_16 = arith.constant dense<0.000000e+00> : vector<128xf32>
    %21 = vector.multi_reduction <add>, %20, %cst_16 [1] : vector<128x128xf32> to vector<128xf32>
    %22 = vector.shape_cast %21 : vector<128xf32> to vector<128x1xf32>
    %23 = math.log %22 : vector<128x1xf32>
    %24 = vector.broadcast %23 : vector<128x1xf32> to vector<128x128xf32>
    %25 = arith.subf %19, %24 : vector<128x128xf32>
    %c0_17 = arith.constant 0 : index
    %c0_18 = arith.constant 0 : index
    %26 = vector.load %arg7[%c0_17, %c0_18] : memref<128x128xf32, #tpu.memory_space<vmem>>, vector<128x128xf32>
    tpu.vector_store %arg7[%c0_17, %c0_18], %25 {strides = array<i32>} : memref<128x128xf32, #tpu.memory_space<vmem>>, vector<128x128xf32>,
    return
  }
  func.func @transform_0(%arg0: i32) -> (i32, i32) {
    %c0_i32 = arith.constant 0 : i32
    %c0_i32_0 = arith.constant 0 : i32
    %c0_i32_1 = arith.constant 0 : i32
    return %c0_i32, %c0_i32_0 : i32, i32
  }
  func.func @transform_1(%arg0: i32) -> (i32, i32) {
    %c0_i32 = arith.constant 0 : i32
    %c0_i32_0 = arith.constant 0 : i32
    %c0_i32_1 = arith.constant 0 : i32
    return %c0_i32, %c0_i32_0 : i32, i32
  }
  func.func @transform_2(%arg0: i32) -> (i32, i32) {
    %c0_i32 = arith.constant 0 : i32
    %c0_i32_0 = arith.constant 0 : i32
    %c0_i32_1 = arith.constant 0 : i32
    return %c0_i32, %c0_i32_0 : i32, i32
  }
  func.func @transform_3(%arg0: i32) -> (i32, i32) {
    %c0_i32 = arith.constant 0 : i32
    %c0_i32_0 = arith.constant 0 : i32
    %c0_i32_1 = arith.constant 0 : i32
    return %c0_i32, %c0_i32_0 : i32, i32
  }
  func.func @transform_4(%arg0: i32) -> (i32, i32) {
    %c0_i32 = arith.constant 0 : i32
    %c0_i32_0 = arith.constant 0 : i32
    %c0_i32_1 = arith.constant 0 : i32
    return %c0_i32, %c0_i32_0 : i32, i32
  }
  func.func @transform_5(%arg0: i32) -> (i32, i32) {
    %c0_i32 = arith.constant 0 : i32
    %c0_i32_0 = arith.constant 0 : i32
    %c0_i32_1 = arith.constant 0 : i32
    return %c0_i32, %c0_i32_0 : i32, i32
  }
  func.func @transform_6(%arg0: i32) -> (i32, i32) {
    %c0_i32 = arith.constant 0 : i32
    %c0_i32_0 = arith.constant 0 : i32
    %c0_i32_1 = arith.constant 0 : i32
    return %c0_i32, %c0_i32_0 : i32, i32
  }
}

</mosaic_0001>

<bundles_post_ra>
// kernel: gcn_net_forward.1
= control target key start
LH: loop header
LB: loop body
LE: loop exit
PB: predicated region body
PF: predicated region fallthrough
CT: control target
= control target key end

     0   :  { %vm59_vm0 = vcmask 261120   ;;  %vm423_vm1 = vcmask 130048   ;;  %s1752_s2 = inlined_call_operand.vmem [shape: f32[32,16], index: 2, kind: input, shape index: {}]   ;;  %s1753_s1 = inlined_call_operand.vmem [shape: f32[128,32], index: 1, kind: input, shape index: {}]   ;;  %s1754_s0 = inlined_call_operand.vmem [shape: f32[128,128], index: 0, kind: input, shape index: {}]   ;;  %s1755_s4 = inlined_call_operand.vmem [shape: f32[16,128], index: 4, kind: input, shape index: {}]   ;;  %s1756_s3 = inlined_call_operand.vmem [shape: f32[1,16], index: 3, kind: input, shape index: {}]   ;;  %s1757_s5 = inlined_call_operand.vmem [shape: f32[1,128], index: 5, kind: input, shape index: {}]   ;;  %s1758_s6 = inlined_call_operand.vmem [shape: f32[128,128], index: 6, kind: output, shape index: {}]  }
   0x1   :  { %v58_v0 = vld [vmem:[%s1752_s2 + $0x18] sm:$0xff]  ;;  %v57_v1 = vld [vmem:[%s1752_s2 + $0x10] sm:$0xff]  ;;  %v39_v2 = vld [vmem:[%s1753_s1] sm:$0xff] }
   0x2   :  { %1085 = vmatprep.subr.mxu0 %v58_v0  ;;  %v56_v3 = vld [vmem:[%s1752_s2 + $0x8] sm:$0xff]  ;;  %1093 = vmatprep.mubr.msk.f32.mxu0 %vm59_vm0, %v39_v2  ;;  %v55_v4 = vld [vmem:[%s1752_s2] sm:$0xff]  ;;  %v41_v6 = vld [vmem:[%s1753_s1 + $0x10] sm:$0xff] }
   0x3   :  { %1086 = vmatpush3.msra.mxu0 %v58_v0  ;;  %v40_v5 = vld [vmem:[%s1753_s1 + $0x8] sm:$0xff]  ;;  %v42_v7 = vld [vmem:[%s1753_s1 + $0x18] sm:$0xff]  ;;  %v43_v8 = vld [vmem:[%s1753_s1 + $0x20] sm:$0xff] }
   0x4   :  { %1087 = vmatprep.subr.mxu0 %v57_v1  ;;  %v44_v9 = vld [vmem:[%s1753_s1 + $0x28] sm:$0xff]  ;;  %v45_v10 = vld [vmem:[%s1753_s1 + $0x30] sm:$0xff]  ;;  %v46_v11 = vld [vmem:[%s1753_s1 + $0x38] sm:$0xff] }
   0x5   :  { %1088 = vmatpush3.msra.mxu0 %v57_v1  ;;  %v47_v12 = vld [vmem:[%s1753_s1 + $0x40] sm:$0xff]  ;;  %v48_v13 = vld [vmem:[%s1753_s1 + $0x48] sm:$0xff]  ;;  %v49_v14 = vld [vmem:[%s1753_s1 + $0x50] sm:$0xff] }
   0x6   :  { %1089 = vmatprep.subr.mxu0 %v56_v3  ;;  %v50_v15 = vld [vmem:[%s1753_s1 + $0x58] sm:$0xff]  ;;  %v51_v16 = vld [vmem:[%s1753_s1 + $0x60] sm:$0xff]  ;;  %v52_v17 = vld [vmem:[%s1753_s1 + $0x68] sm:$0xff] }
   0x7   :  { %1090 = vmatpush3.msra.mxu0 %v56_v3  ;;  %v53_v18 = vld [vmem:[%s1753_s1 + $0x70] sm:$0xff]  ;;  %v54_v19 = vld [vmem:[%s1753_s1 + $0x78] sm:$0xff]  ;;  %v1467_v20 = vld [vmem:[%s1754_s0] sm:$0xff] }
   0x8   :  { %1091 = vmatprep.subr.mxu0 %v55_v4  ;;  %1149 = vmatprep.mubr.f32.mxu1 %v1467_v20  ;;  %v422_v21 = vld [vmem:[%s1755_s4 + $0x8] sm:$0xff]  ;;  %v421_v22 = vld [vmem:[%s1755_s4] sm:$0xff]  ;;  %v1484_v40 = vld [vmem:[%s1754_s0 + $0x10] sm:$0xff] }
   0x9   :  { %1092 = vmatpush3.msra.mxu0 %v55_v4  ;;  %v1479_v39 = vld [vmem:[%s1754_s0 + $0x8] sm:$0xff]  ;;  %v1491_v41 = vld [vmem:[%s1754_s0 + $0x18] sm:$0xff]  ;;  %v1496_v42 = vld [vmem:[%s1754_s0 + $0x20] sm:$0xff] }
   0xa   :  { %1094 = vmatmul.mubr.msk.f32.vlgmr.msra.gmra.mxu0 %vm59_vm0, %v40_v5  ;;  %1173 = vmatprep.subr.mxu0 %v422_v21  ;;  %v1503_v43 = vld [vmem:[%s1754_s0 + $0x28] sm:$0xff]  ;;  %v29_v44 = vld [vmem:[%s1754_s0 + $0x30] sm:$0xff]  ;;  %v1512_v45 = vld [vmem:[%s1754_s0 + $0x38] sm:$0xff] }
   0xb   :  { %1096 = vmatprep.mubr.msk.f32.mxu0 %vm59_vm0, %v41_v6  ;;  %1174 = vmatpush3.msra.mxu0 %v422_v21  ;;  %v1517_v46 = vld [vmem:[%s1754_s0 + $0x40] sm:$0xff]  ;;  %v1524_v47 = vld [vmem:[%s1754_s0 + $0x48] sm:$0xff]  ;;  %v1529_v48 = vld [vmem:[%s1754_s0 + $0x50] sm:$0xff] }
   0xc   :  { %1175 = vmatprep.subr.mxu0 %v421_v22  ;;  %v1536_v49 = vld [vmem:[%s1754_s0 + $0x58] sm:$0xff]  ;;  %v1541_v50 = vld [vmem:[%s1754_s0 + $0x60] sm:$0xff]  ;;  %v1548_v51 = vld [vmem:[%s1754_s0 + $0x68] sm:$0xff] }
   0xd   :  { %1176 = vmatpush3.msra.mxu0 %v421_v22  ;;  %v1553_v52 = vld [vmem:[%s1754_s0 + $0x70] sm:$0xff]  ;;  %v1560_v53 = vld [vmem:[%s1754_s0 + $0x78] sm:$0xff]  ;;  %v965_v54 = vld [vmem:[%s1756_s3] ss:$0 sm:$0xff] }
   0xe   :  { %1097 = vmatmul.mubr.msk.f32.gmra.mxu0 %vm59_vm0, %v42_v7 }
   0xf   :  { %1099 = vmatprep.mubr.msk.f32.mxu0 %vm59_vm0, %v43_v8 }
  0x12   :  { %1100 = vmatmul.mubr.msk.f32.gmra.mxu0 %vm59_vm0, %v44_v9 }
  0x13   :  { %1102 = vmatprep.mubr.msk.f32.mxu0 %vm59_vm0, %v45_v10 }
  0x16   :  { %1103 = vmatmul.mubr.msk.f32.gmra.mxu0 %vm59_vm0, %v46_v11 }
  0x17   :  { %1105 = vmatprep.mubr.msk.f32.mxu0 %vm59_vm0, %v47_v12 }
  0x1a   :  { %1106 = vmatmul.mubr.msk.f32.gmra.mxu0 %vm59_vm0, %v48_v13 }
  0x1b   :  { %1108 = vmatprep.mubr.msk.f32.mxu0 %vm59_vm0, %v49_v14 }
  0x1e   :  { %1109 = vmatmul.mubr.msk.f32.gmra.mxu0 %vm59_vm0, %v50_v15 }
  0x1f   :  { %1111 = vmatprep.mubr.msk.f32.mxu0 %vm59_vm0, %v51_v16 }
  0x22   :  { %1112 = vmatmul.mubr.msk.f32.gmra.mxu0 %vm59_vm0, %v52_v17 }
  0x23   :  { %1114 = vmatprep.mubr.msk.f32.mxu0 %vm59_vm0, %v53_v18 }
  0x26   :  { %1115 = vmatmul.mubr.msk.f32.gmra.mxu0 %vm59_vm0, %v54_v19 }
  0xca   :  { %v1095_v23 = vpop.f32.mrf.mxu0 }
  0xcc   :  { %v174_v24 = vpop.f32.mrf.mxu0 }
  0xce   :  { %v1098_v25 = vpop.f32.mrf.mxu0 }
  0xd0   :  { %v184_v26 = vpop.f32.mrf.mxu0 }
  0xd2   :  { %v1101_v27 = vpop.f32.mrf.mxu0 }
  0xd4   :  { %v194_v28 = vpop.f32.mrf.mxu0 }
  0xd6   :  { %v1104_v29 = vpop.f32.mrf.mxu0 }
  0xd8   :  { %v204_v30 = vpop.f32.mrf.mxu0 }
  0xda   :  { %v1107_v31 = vpop.f32.mrf.mxu0 }
  0xdc   :  { %v214_v32 = vpop.f32.mrf.mxu0 }
  0xde   :  { %v1110_v33 = vpop.f32.mrf.mxu0 }
  0xe0   :  { %v224_v34 = vpop.f32.mrf.mxu0 }
  0xe2   :  { %v1113_v35 = vpop.f32.mrf.mxu0 }
  0xe4   :  { %v234_v36 = vpop.f32.mrf.mxu0 }
  0xe6   :  { %v1116_v37 = vpop.f32.mrf.mxu0 }
  0xe7   :  { %1117 = vmatprep.subr.mxu1 %v1116_v37 }
  0xe8   :  { %v244_v38 = vpop.f32.mrf.mxu0  ;;  %1118 = vmatpush3.msra.mxu1 %v1116_v37 }
  0xe9   :  { %1119 = vmatprep.subr.mxu1 %v244_v38 }
  0xea   :  { %1120 = vmatpush3.msra.mxu1 %v244_v38 }
  0xeb   :  { %1121 = vmatprep.subr.mxu1 %v1113_v35 }
  0xec   :  { %1122 = vmatpush3.msra.mxu1 %v1113_v35 }
  0xed   :  { %1123 = vmatprep.subr.mxu1 %v234_v36 }
  0xee   :  { %1124 = vmatpush3.msra.mxu1 %v234_v36 }
  0xef   :  { %1125 = vmatprep.subr.mxu1 %v1110_v33 }
  0xf0   :  { %1126 = vmatpush3.msra.mxu1 %v1110_v33 }
  0xf1   :  { %1127 = vmatprep.subr.mxu1 %v224_v34 }
  0xf2   :  { %1128 = vmatpush3.msra.mxu1 %v224_v34 }
  0xf3   :  { %1129 = vmatprep.subr.mxu1 %v1107_v31 }
  0xf4   :  { %1130 = vmatpush3.msra.mxu1 %v1107_v31 }
  0xf5   :  { %1131 = vmatprep.subr.mxu1 %v214_v32 }
  0xf6   :  { %1132 = vmatpush3.msra.mxu1 %v214_v32 }
  0xf7   :  { %1133 = vmatprep.subr.mxu1 %v1104_v29 }
  0xf8   :  { %1134 = vmatpush3.msra.mxu1 %v1104_v29 }
  0xf9   :  { %1135 = vmatprep.subr.mxu1 %v204_v30 }
  0xfa   :  { %1136 = vmatpush3.msra.mxu1 %v204_v30 }
  0xfb   :  { %1137 = vmatprep.subr.mxu1 %v1101_v27 }
  0xfc   :  { %1138 = vmatpush3.msra.mxu1 %v1101_v27 }
  0xfd   :  { %1139 = vmatprep.subr.mxu1 %v194_v28 }
  0xfe   :  { %1140 = vmatpush3.msra.mxu1 %v194_v28 }
  0xff   :  { %1141 = vmatprep.subr.mxu1 %v1098_v25 }
 0x100   :  { %1142 = vmatpush3.msra.mxu1 %v1098_v25 }
 0x101   :  { %1143 = vmatprep.subr.mxu1 %v184_v26 }
 0x102   :  { %1144 = vmatpush3.msra.mxu1 %v184_v26 }
 0x103   :  { %1145 = vmatprep.subr.mxu1 %v1095_v23 }
 0x104   :  { %1146 = vmatpush3.msra.mxu1 %v1095_v23 }
 0x105   :  { %1147 = vmatprep.subr.mxu1 %v174_v24 }
 0x106   :  { %1148 = vmatpush3.msra.mxu1 %v174_v24 }
 0x107   :  { %1150 = vmatmul.mubr.f32.vlgmr.msra.gmra.mxu1 %v1479_v39 }
 0x108   :  { %1152 = vmatprep.mubr.f32.mxu1 %v1484_v40 }
 0x10b   :  { %1153 = vmatmul.mubr.f32.gmra.mxu1 %v1491_v41 }
 0x10c   :  { %1155 = vmatprep.mubr.f32.mxu1 %v1496_v42 }
 0x10f   :  { %1156 = vmatmul.mubr.f32.gmra.mxu1 %v1503_v43 }
 0x110   :  { %1158 = vmatprep.mubr.f32.mxu1 %v29_v44 }
 0x113   :  { %1159 = vmatmul.mubr.f32.gmra.mxu1 %v1512_v45 }
 0x114   :  { %1161 = vmatprep.mubr.f32.mxu1 %v1517_v46 }
 0x117   :  { %1162 = vmatmul.mubr.f32.gmra.mxu1 %v1524_v47 }
 0x118   :  { %1164 = vmatprep.mubr.f32.mxu1 %v1529_v48 }
 0x11b   :  { %1165 = vmatmul.mubr.f32.gmra.mxu1 %v1536_v49 }
 0x11c   :  { %1167 = vmatprep.mubr.f32.mxu1 %v1541_v50 }
 0x11f   :  { %1168 = vmatmul.mubr.f32.gmra.mxu1 %v1548_v51 }
 0x120   :  { %1170 = vmatprep.mubr.f32.mxu1 %v1553_v52 }
 0x123   :  { %1171 = vmatmul.mubr.f32.gmra.mxu1 %v1560_v53 }
 0x124   :  { %1242 = vmatprep.mubr.f32.mxu1 %v29_v44 }
 0x1c7   :  { %v1151_v55 = vpop.f32.mrf.mxu1 }
 0x1c8   :  { %v332_v56 = vadd.f32 %v1151_v55, %v965_v54 }
 0x1c9   :  { %v326_v57 = vpop.f32.mrf.mxu1 }
 0x1ca   :  { %v327_v58 = vadd.f32 %v965_v54, %v326_v57  ;;  %v406_v61 = vmax.f32 %v332_v56, 0.0 }
 0x1cb   :  { %v1154_v59 = vpop.f32.mrf.mxu1 }
 0x1cc   :  { %v405_v60 = vmax.f32 %v327_v58, 0.0  ;;  %v342_v62 = vadd.f32 %v1154_v59, %v965_v54 }
 0x1cd   :  { %v336_v63 = vpop.f32.mrf.mxu1 }
 0x1ce   :  { %v337_v0 = vadd.f32 %v965_v54, %v336_v63  ;;  %1177 = vmatprep.mubr.msk.f32.mxu0 %vm423_vm1, %v405_v60  ;;  %v408_v3 = vmax.f32 %v342_v62, 0.0 }
 0x1cf   :  { %v1157_v1 = vpop.f32.mrf.mxu1  ;;  %1178 = vmatmul.mubr.msk.f32.vlgmr.msra.gmra.mxu0 %vm423_vm1, %v406_v61 }
 0x1d0   :  { %v407_v2 = vmax.f32 %v337_v0, 0.0  ;;  %v352_v4 = vadd.f32 %v1157_v1, %v965_v54 }
 0x1d1   :  { %v346_v5 = vpop.f32.mrf.mxu1 }
 0x1d2   :  { %v347_v6 = vadd.f32 %v965_v54, %v346_v5  ;;  %1180 = vmatprep.mubr.msk.f32.mxu0 %vm423_vm1, %v407_v2  ;;  %v410_v9 = vmax.f32 %v352_v4, 0.0 }
 0x1d3   :  { %v1160_v7 = vpop.f32.mrf.mxu1  ;;  %1181 = vmatmul.mubr.msk.f32.gmra.mxu0 %vm423_vm1, %v408_v3 }
 0x1d4   :  { %v409_v8 = vmax.f32 %v347_v6, 0.0  ;;  %v362_v10 = vadd.f32 %v1160_v7, %v965_v54 }
 0x1d5   :  { %v356_v11 = vpop.f32.mrf.mxu1 }
 0x1d6   :  { %v357_v12 = vadd.f32 %v965_v54, %v356_v11  ;;  %1183 = vmatprep.mubr.msk.f32.mxu0 %vm423_vm1, %v409_v8  ;;  %v412_v15 = vmax.f32 %v362_v10, 0.0 }
 0x1d7   :  { %v1163_v13 = vpop.f32.mrf.mxu1  ;;  %1184 = vmatmul.mubr.msk.f32.gmra.mxu0 %vm423_vm1, %v410_v9 }
 0x1d8   :  { %v411_v14 = vmax.f32 %v357_v12, 0.0  ;;  %v372_v16 = vadd.f32 %v1163_v13, %v965_v54 }
 0x1d9   :  { %v366_v17 = vpop.f32.mrf.mxu1 }
 0x1da   :  { %v367_v18 = vadd.f32 %v965_v54, %v366_v17  ;;  %1186 = vmatprep.mubr.msk.f32.mxu0 %vm423_vm1, %v411_v14  ;;  %v414_v22 = vmax.f32 %v372_v16, 0.0 }
 0x1db   :  { %v1166_v19 = vpop.f32.mrf.mxu1  ;;  %1187 = vmatmul.mubr.msk.f32.gmra.mxu0 %vm423_vm1, %v412_v15 }
 0x1dc   :  { %v413_v21 = vmax.f32 %v367_v18, 0.0  ;;  %v382_v23 = vadd.f32 %v1166_v19, %v965_v54 }
 0x1dd   :  { %v376_v24 = vpop.f32.mrf.mxu1 }
 0x1de   :  { %v377_v25 = vadd.f32 %v965_v54, %v376_v24  ;;  %1189 = vmatprep.mubr.msk.f32.mxu0 %vm423_vm1, %v413_v21  ;;  %v416_v28 = vmax.f32 %v382_v23, 0.0 }
 0x1df   :  { %v1169_v26 = vpop.f32.mrf.mxu1  ;;  %1190 = vmatmul.mubr.msk.f32.gmra.mxu0 %vm423_vm1, %v414_v22 }
 0x1e0   :  { %v415_v27 = vmax.f32 %v377_v25, 0.0  ;;  %v392_v29 = vadd.f32 %v1169_v26, %v965_v54 }
 0x1e1   :  { %v386_v30 = vpop.f32.mrf.mxu1 }
 0x1e2   :  { %v387_v31 = vadd.f32 %v965_v54, %v386_v30  ;;  %1192 = vmatprep.mubr.msk.f32.mxu0 %vm423_vm1, %v415_v27  ;;  %v418_v34 = vmax.f32 %v392_v29, 0.0 }
 0x1e3   :  { %v1172_v32 = vpop.f32.mrf.mxu1  ;;  %1193 = vmatmul.mubr.msk.f32.gmra.mxu0 %vm423_vm1, %v416_v28 }
 0x1e4   :  { %v417_v33 = vmax.f32 %v387_v31, 0.0  ;;  %v402_v35 = vadd.f32 %v1172_v32, %v965_v54 }
 0x1e5   :  { %v396_v36 = vpop.f32.mrf.mxu1 }
 0x1e6   :  { %v397_v37 = vadd.f32 %v965_v54, %v396_v36  ;;  %1195 = vmatprep.mubr.msk.f32.mxu0 %vm423_vm1, %v417_v33  ;;  %v420_v44 = vmax.f32 %v402_v35, 0.0 }
 0x1e7   :  { %1196 = vmatmul.mubr.msk.f32.gmra.mxu0 %vm423_vm1, %v418_v34 }
 0x1e8   :  { %v419_v38 = vmax.f32 %v397_v37, 0.0 }
 0x1ea   :  { %1198 = vmatprep.mubr.msk.f32.mxu0 %vm423_vm1, %v419_v38 }
 0x1eb   :  { %1199 = vmatmul.mubr.msk.f32.gmra.mxu0 %vm423_vm1, %v420_v44 }
 0x1ec   :  { %1233 = vmatprep.mubr.f32.mxu0 %v1467_v20 }
 0x28f   :  { %v1583_v55 = vpop.f32.mrf.mxu0 }
 0x291   :  { %v1585_v56 = vpop.f32.mrf.mxu0 }
 0x293   :  { %v1587_v57 = vpop.f32.mrf.mxu0 }
 0x295   :  { %v1589_v58 = vpop.f32.mrf.mxu0 }
 0x297   :  { %v1185_v54 = vpop.f32.mrf.mxu0 }
 0x299   :  { %v558_v59 = vpop.f32.mrf.mxu0 }
 0x29b   :  { %v1188_v60 = vpop.f32.mrf.mxu0 }
 0x29d   :  { %v568_v61 = vpop.f32.mrf.mxu0 }
 0x29f   :  { %v1191_v62 = vpop.f32.mrf.mxu0 }
 0x2a1   :  { %v578_v63 = vpop.f32.mrf.mxu0 }
 0x2a3   :  { %v1194_v0 = vpop.f32.mrf.mxu0 }
 0x2a5   :  { %v588_v1 = vpop.f32.mrf.mxu0 }
 0x2a7   :  { %v1197_v2 = vpop.f32.mrf.mxu0 }
 0x2a9   :  { %v598_v3 = vpop.f32.mrf.mxu0 }
 0x2ab   :  { %v1200_v4 = vpop.f32.mrf.mxu0 }
 0x2ac   :  { %1201 = vmatprep.subr.mxu0 %v1200_v4  ;;  %1257 = vmatprep.subr.mxu1 %v1200_v4 }
 0x2ad   :  { %v608_v20 = vpop.f32.mrf.mxu0  ;;  %1202 = vmatpush3.msra.mxu0 %v1200_v4  ;;  %1273 = vmatpush3.msra.mxu1 %v1200_v4 }
 0x2ae   :  { %1203 = vmatprep.subr.mxu0 %v608_v20  ;;  %1258 = vmatprep.subr.mxu1 %v608_v20 }
 0x2af   :  { %1204 = vmatpush3.msra.mxu0 %v608_v20  ;;  %1274 = vmatpush3.msra.mxu1 %v608_v20 }
 0x2b0   :  { %1205 = vmatprep.subr.mxu0 %v1197_v2  ;;  %1259 = vmatprep.subr.mxu1 %v1197_v2 }
 0x2b1   :  { %1206 = vmatpush3.msra.mxu0 %v1197_v2  ;;  %1275 = vmatpush3.msra.mxu1 %v1197_v2 }
 0x2b2   :  { %1207 = vmatprep.subr.mxu0 %v598_v3  ;;  %1260 = vmatprep.subr.mxu1 %v598_v3 }
 0x2b3   :  { %1208 = vmatpush3.msra.mxu0 %v598_v3  ;;  %1276 = vmatpush3.msra.mxu1 %v598_v3 }
 0x2b4   :  { %1209 = vmatprep.subr.mxu0 %v1194_v0  ;;  %1261 = vmatprep.subr.mxu1 %v1194_v0 }
 0x2b5   :  { %1210 = vmatpush3.msra.mxu0 %v1194_v0  ;;  %1277 = vmatpush3.msra.mxu1 %v1194_v0 }
 0x2b6   :  { %1211 = vmatprep.subr.mxu0 %v588_v1  ;;  %1262 = vmatprep.subr.mxu1 %v588_v1 }
 0x2b7   :  { %1212 = vmatpush3.msra.mxu0 %v588_v1  ;;  %1278 = vmatpush3.msra.mxu1 %v588_v1 }
 0x2b8   :  { %1213 = vmatprep.subr.mxu0 %v1191_v62  ;;  %1263 = vmatprep.subr.mxu1 %v1191_v62 }
 0x2b9   :  { %1214 = vmatpush3.msra.mxu0 %v1191_v62  ;;  %1279 = vmatpush3.msra.mxu1 %v1191_v62 }
 0x2ba   :  { %1215 = vmatprep.subr.mxu0 %v578_v63  ;;  %1264 = vmatprep.subr.mxu1 %v578_v63 }
 0x2bb   :  { %1216 = vmatpush3.msra.mxu0 %v578_v63  ;;  %1280 = vmatpush3.msra.mxu1 %v578_v63 }
 0x2bc   :  { %1217 = vmatprep.subr.mxu0 %v1188_v60  ;;  %1265 = vmatprep.subr.mxu1 %v1188_v60 }
 0x2bd   :  { %1218 = vmatpush3.msra.mxu0 %v1188_v60  ;;  %1281 = vmatpush3.msra.mxu1 %v1188_v60 }
 0x2be   :  { %1219 = vmatprep.subr.mxu0 %v568_v61  ;;  %1266 = vmatprep.subr.mxu1 %v568_v61 }
 0x2bf   :  { %1220 = vmatpush3.msra.mxu0 %v568_v61  ;;  %1282 = vmatpush3.msra.mxu1 %v568_v61 }
 0x2c0   :  { %1221 = vmatprep.subr.mxu0 %v1185_v54  ;;  %1267 = vmatprep.subr.mxu1 %v1185_v54 }
 0x2c1   :  { %1222 = vmatpush3.msra.mxu0 %v1185_v54  ;;  %1283 = vmatpush3.msra.mxu1 %v1185_v54 }
 0x2c2   :  { %1223 = vmatprep.subr.mxu0 %v558_v59  ;;  %1268 = vmatprep.subr.mxu1 %v558_v59 }
 0x2c3   :  { %1224 = vmatpush3.msra.mxu0 %v558_v59  ;;  %1284 = vmatpush3.msra.mxu1 %v558_v59 }
 0x2c4   :  { %1225 = vmatprep.subr.mxu0 %v1587_v57  ;;  %1269 = vmatprep.subr.mxu1 %v1587_v57 }
 0x2c5   :  { %1226 = vmatpush3.msra.mxu0 %v1587_v57  ;;  %1285 = vmatpush3.msra.mxu1 %v1587_v57 }
 0x2c6   :  { %1227 = vmatprep.subr.mxu0 %v1589_v58  ;;  %1270 = vmatprep.subr.mxu1 %v1589_v58 }
 0x2c7   :  { %1228 = vmatpush3.msra.mxu0 %v1589_v58  ;;  %1286 = vmatpush3.msra.mxu1 %v1589_v58 }
 0x2c8   :  { %1229 = vmatprep.subr.mxu0 %v1583_v55  ;;  %1271 = vmatprep.subr.mxu1 %v1583_v55 }
 0x2c9   :  { %1230 = vmatpush3.msra.mxu0 %v1583_v55  ;;  %1287 = vmatpush3.msra.mxu1 %v1583_v55 }
 0x2ca   :  { %1231 = vmatprep.subr.mxu0 %v1585_v56  ;;  %1272 = vmatprep.subr.mxu1 %v1585_v56 }
 0x2cb   :  { %1232 = vmatpush3.msra.mxu0 %v1585_v56  ;;  %1288 = vmatpush3.msra.mxu1 %v1585_v56 }
 0x2cc   :  { %1234 = vmatmul.mubr.f32.vlgmr.msra.gmra.mxu0 %v1479_v39  ;;  %1243 = vmatmul.mubr.f32.vlgmr.msra.gmra.mxu1 %v1512_v45  ;;  %v982_v39 = vld [vmem:[%s1757_s5] ss:$0 sm:$0xff] }
 0x2cd   :  { %1236 = vmatprep.mubr.f32.mxu0 %v1484_v40  ;;  %1245 = vmatprep.mubr.f32.mxu1 %v1517_v46 }
 0x2d0   :  { %1237 = vmatmul.mubr.f32.gmra.mxu0 %v1491_v41  ;;  %1246 = vmatmul.mubr.f32.gmra.mxu1 %v1524_v47 }
 0x2d1   :  { %1239 = vmatprep.mubr.f32.mxu0 %v1496_v42  ;;  %1248 = vmatprep.mubr.f32.mxu1 %v1529_v48 }
 0x2d4   :  { %1240 = vmatmul.mubr.f32.gmra.mxu0 %v1503_v43  ;;  %1249 = vmatmul.mubr.f32.gmra.mxu1 %v1536_v49 }
 0x2d5   :  { %1251 = vmatprep.mubr.f32.mxu1 %v1541_v50 }
 0x2d8   :  { %1252 = vmatmul.mubr.f32.gmra.mxu1 %v1548_v51 }
 0x2d9   :  { %1254 = vmatprep.mubr.f32.mxu1 %v1553_v52 }
 0x2dc   :  { %1255 = vmatmul.mubr.f32.gmra.mxu1 %v1560_v53 }
 0x38c   :  { %v1235_v40 = vpop.f32.mrf.mxu0  ;;  %v1244_v41 = vpop.f32.mrf.mxu1 }
 0x38d   :  { %v696_v42 = vadd.f32 %v1235_v40, %v982_v39  ;;  %v726_v45 = vadd.f32 %v1244_v41, %v982_v39 }
 0x38e   :  { %v690_v46 = vpop.f32.mrf.mxu0  ;;  %v720_v43 = vpop.f32.mrf.mxu1 }
 0x38f   :  { %783 = vmax.xlane.f32.xlu1 %v726_v45  ;;  %771 = vmax.xlane.f32.xlu0 %v696_v42  ;;  %v691_v49 = vadd.f32 %v982_v39, %v690_v46  ;;  %v721_v7 = vadd.f32 %v982_v39, %v720_v43 }
 0x390   :  { %v1238_v47 = vpop.f32.mrf.mxu0  ;;  %v1247_v48 = vpop.f32.mrf.mxu1 }
 0x391   :  { %v706_v50 = vadd.f32 %v1238_v47, %v982_v39  ;;  %v736_v5 = vadd.f32 %v1247_v48, %v982_v39 }
 0x392   :  { %v700_v51 = vpop.f32.mrf.mxu0  ;;  %v730_v52 = vpop.f32.mrf.mxu1 }
 0x393   :  { %775 = vmax.xlane.f32.xlu1 %v706_v50  ;;  %769 = vmax.xlane.f32.xlu0 %v691_v49  ;;  %v701_v11 = vadd.f32 %v982_v39, %v700_v51  ;;  %v731_v12 = vadd.f32 %v982_v39, %v730_v52 }
 0x394   :  { %v1241_v53 = vpop.f32.mrf.mxu0  ;;  %v1250_v6 = vpop.f32.mrf.mxu1 }
 0x395   :  { %v716_v13 = vadd.f32 %v1241_v53, %v982_v39  ;;  %v746_v16 = vadd.f32 %v1250_v6, %v982_v39 }
 0x396   :  { %v740_v8 = vpop.f32.mrf.mxu1  ;;  %v710_v9 = vpop.f32.mrf.mxu0 }
 0x397   :  { %787 = vmax.xlane.f32.xlu1 %v736_v5  ;;  %781 = vmax.xlane.f32.xlu0 %v721_v7  ;;  %v711_v14 = vadd.f32 %v982_v39, %v710_v9  ;;  %v741_v17 = vadd.f32 %v982_v39, %v740_v8 }
 0x398   :  { %v1253_v10 = vpop.f32.mrf.mxu1 }
 0x399   :  { %v1624_v19 = vadd.f32 %v1253_v10, %v982_v39 }
 0x39a   :  { %v750_v15 = vpop.f32.mrf.mxu1 }
 0x39b   :  { %773 = vmax.xlane.f32.xlu1 %v701_v11  ;;  %785 = vmax.xlane.f32.xlu0 %v731_v12  ;;  %v1626_v21 = vadd.f32 %v982_v39, %v750_v15 }
 0x39c   :  { %v1256_v18 = vpop.f32.mrf.mxu1 }
 0x39d   :  { %v1628_v23 = vadd.f32 %v1256_v18, %v982_v39 }
 0x39e   :  { %v760_v22 = vpop.f32.mrf.mxu1 }
 0x39f   :  { %779 = vmax.xlane.f32.xlu1 %v716_v13  ;;  %777 = vmax.xlane.f32.xlu0 %v711_v14  ;;  %v1632_v24 = vadd.f32 %v982_v39, %v760_v22 }
 0x3a3   :  { %791 = vmax.xlane.f32.xlu1 %v746_v16  ;;  %789 = vmax.xlane.f32.xlu0 %v741_v17 }
 0x3a7   :  { %795 = vmax.xlane.f32.xlu1 %v1624_v19  ;;  %793 = vmax.xlane.f32.xlu0 %v1626_v21 }
 0x3ab   :  { %799 = vmax.xlane.f32.xlu1 %v1628_v23  ;;  %797 = vmax.xlane.f32.xlu0 %v1632_v24 }
 0x418   :  { %v784_v25 = vpop.xlane.xlu1 %783  ;;  %v772_v26 = vpop.xlane.xlu0 %771 }
 0x419   :  { %v1636_v27 = vsub.f32 %v726_v45, %v784_v25  ;;  %v1638_v28 = vsub.f32 %v696_v42, %v772_v26 }
 0x41b   :  { %v819_v29 = vmul.f32 1.442695, %v1638_v28  ;;  %v831_v32 = vmul.f32 1.442695, %v1636_v27 }
 0x41c   :  { %v776_v30 = vpop.xlane.xlu1 %775  ;;  %v770_v31 = vpop.xlane.xlu0 %769 }
 0x41d   :  { %v1642_v33 = vsub.f32 %v706_v50, %v776_v30  ;;  %v1644_v34 = vsub.f32 %v691_v49, %v770_v31  ;;  %1289 = vpow2.f32 %v819_v29 }
 0x41e   :  { %1291 = vpow2.f32 %v831_v32 }
 0x41f   :  { %v817_v35 = vmul.f32 1.442695, %v1644_v34  ;;  %v823_v38 = vmul.f32 1.442695, %v1642_v33 }
 0x420   :  { %v788_v36 = vpop.xlane.xlu1 %787  ;;  %v782_v37 = vpop.xlane.xlu0 %781 }
 0x421   :  { %v1648_v44 = vsub.f32 %v721_v7, %v782_v37  ;;  %1293 = vpow2.f32 %v817_v35  ;;  %v1650_v55 = vsub.f32 %v736_v5, %v788_v36 }
 0x422   :  { %1295 = vpow2.f32 %v823_v38 }
 0x423   :  { %v829_v56 = vmul.f32 1.442695, %v1648_v44  ;;  %v835_v59 = vmul.f32 1.442695, %v1650_v55 }
 0x424   :  { %v774_v57 = vpop.xlane.xlu1 %773  ;;  %v786_v58 = vpop.xlane.xlu0 %785 }
 0x425   :  { %v1653_v54 = vsub.f32 %v701_v11, %v774_v57  ;;  %1297 = vpow2.f32 %v829_v56  ;;  %v1656_v60 = vsub.f32 %v731_v12, %v786_v58 }
 0x427   :  { %v821_v61 = vmul.f32 1.442695, %v1653_v54  ;;  %v833_v1 = vmul.f32 1.442695, %v1656_v60 }
 0x428   :  { %v780_v62 = vpop.xlane.xlu1 %779  ;;  %v778_v63 = vpop.xlane.xlu0 %777 }
 0x429   :  { %1299 = vpow2.f32 %v821_v61  ;;  %v1659_v0 = vsub.f32 %v716_v13, %v780_v62  ;;  %v1662_v2 = vsub.f32 %v711_v14, %v778_v63 }
 0x42a   :  { %1301 = vpow2.f32 %v835_v59  ;;  %v1290_v3 = vpop.eup %1289 }
 0x42b   :  { %v827_v4 = vmul.f32 1.442695, %v1659_v0  ;;  %851 = vadd.xlane.f32.xlu1 %v1290_v3  ;;  %v1292_v41 = vpop.eup %1291  ;;  %v825_v42 = vmul.f32 1.442695, %v1662_v2 }
 0x42c   :  { %v792_v20 = vpop.xlane.xlu1 %791  ;;  %v790_v39 = vpop.xlane.xlu0 %789 }
 0x42d   :  { %1303 = vpow2.f32 %v827_v4  ;;  %v1665_v40 = vsub.f32 %v746_v16, %v792_v20  ;;  %v1668_v45 = vsub.f32 %v741_v17, %v790_v39 }
 0x42e   :  { %1305 = vpow2.f32 %v833_v1  ;;  %v1294_v46 = vpop.eup %1293 }
 0x42f   :  { %v839_v43 = vmul.f32 1.442695, %v1665_v40  ;;  %863 = vadd.xlane.f32.xlu1 %v1292_v41  ;;  %849 = vadd.xlane.f32.xlu0 %v1294_v46  ;;  %v1296_v50 = vpop.eup %1295  ;;  %v837_v51 = vmul.f32 1.442695, %v1668_v45 }
 0x430   :  { %v796_v47 = vpop.xlane.xlu1 %795  ;;  %v794_v48 = vpop.xlane.xlu0 %793 }
 0x431   :  { %1307 = vpow2.f32 %v839_v43  ;;  %v1672_v49 = vsub.f32 %v1624_v19, %v796_v47  ;;  %v1676_v52 = vsub.f32 %v1626_v21, %v794_v48 }
 0x432   :  { %1309 = vpow2.f32 %v825_v42  ;;  %v1298_v5 = vpop.eup %1297 }
 0x433   :  { %v843_v53 = vmul.f32 1.442695, %v1672_v49  ;;  %855 = vadd.xlane.f32.xlu1 %v1296_v50  ;;  %861 = vadd.xlane.f32.xlu0 %v1298_v5  ;;  %v841_v10 = vmul.f32 1.442695, %v1676_v52 }
 0x434   :  { %v800_v6 = vpop.xlane.xlu1 %799  ;;  %v798_v7 = vpop.xlane.xlu0 %797 }
 0x435   :  { %1311 = vpow2.f32 %v843_v53  ;;  %v1680_v8 = vsub.f32 %v1628_v23, %v800_v6  ;;  %v1684_v11 = vsub.f32 %v1632_v24, %v798_v7 }
 0x436   :  { %v1300_v9 = vpop.eup %1299  ;;  %1313 = vpow2.f32 %v837_v51 }
 0x437   :  { %v1302_v12 = vpop.eup %1301  ;;  %v847_v13 = vmul.f32 1.442695, %v1680_v8  ;;  %853 = vadd.xlane.f32.xlu0 %v1300_v9  ;;  %v845_v15 = vmul.f32 1.442695, %v1684_v11 }
 0x438   :  { %867 = vadd.xlane.f32.xlu1 %v1302_v12 }
 0x439   :  { %1315 = vpow2.f32 %v847_v13 }
 0x43a   :  { %v1304_v14 = vpop.eup %1303  ;;  %1317 = vpow2.f32 %v841_v10 }
 0x43b   :  { %v1306_v16 = vpop.eup %1305  ;;  %1319 = vpow2.f32 %v845_v15 }
 0x43c   :  { %859 = vadd.xlane.f32.xlu1 %v1304_v14  ;;  %865 = vadd.xlane.f32.xlu0 %v1306_v16 }
 0x43e   :  { %v1308_v17 = vpop.eup %1307 }
 0x43f   :  { %v1310_v18 = vpop.eup %1309 }
 0x440   :  { %871 = vadd.xlane.f32.xlu1 %v1308_v17  ;;  %857 = vadd.xlane.f32.xlu0 %v1310_v18 }
 0x442   :  { %v1312_v19 = vpop.eup %1311 }
 0x443   :  { %v1314_v21 = vpop.eup %1313 }
 0x444   :  { %875 = vadd.xlane.f32.xlu1 %v1312_v19  ;;  %869 = vadd.xlane.f32.xlu0 %v1314_v21 }
 0x446   :  { %v1316_v22 = vpop.eup %1315 }
 0x447   :  { %v1318_v23 = vpop.eup %1317 }
 0x448   :  { %879 = vadd.xlane.f32.xlu1 %v1316_v22  ;;  %873 = vadd.xlane.f32.xlu0 %v1318_v23  ;;  %v1320_v24 = vpop.eup %1319 }
 0x44c   :  { %877 = vadd.xlane.f32.xlu0 %v1320_v24 }
 0x4b4   :  { %v852_v25 = vpop.xlane.xlu1 %851 }
 0x4b5   :  { %1321 = vlog2.f32 %v852_v25 }
 0x4b8   :  { %v864_v26 = vpop.xlane.xlu1 %863  ;;  %v850_v29 = vpop.xlane.xlu0 %849 }
 0x4b9   :  { %1323 = vlog2.f32 %v864_v26 }
 0x4ba   :  { %1325 = vlog2.f32 %v850_v29 }
 0x4bc   :  { %v856_v30 = vpop.xlane.xlu1 %855  ;;  %v862_v31 = vpop.xlane.xlu0 %861 }
 0x4bd   :  { %1327 = vlog2.f32 %v856_v30 }
 0x4be   :  { %1329 = vlog2.f32 %v862_v31 }
 0x4c0   :  { %v854_v35 = vpop.xlane.xlu0 %853 }
 0x4c1   :  { %v868_v32 = vpop.xlane.xlu1 %867 }
 0x4c2   :  { %1331 = vlog2.f32 %v868_v32  ;;  %v1322_v36 = vpop.eup %1321 }
 0x4c3   :  { %1333 = vlog2.f32 %v854_v35  ;;  %v884_v37 = vmul.f32 0.6931472, %v1322_v36 }
 0x4c5   :  { %v860_v38 = vpop.xlane.xlu1 %859  ;;  %v866_v56 = vpop.xlane.xlu0 %865  ;;  %v914_v57 = vsub.f32 %v1638_v28, %v884_v37 }
 0x4c6   :  { %1335 = vlog2.f32 %v860_v38  ;;  %v1324_v58 = vpop.eup %1323 }
 0x4c7   :  { %1337 = vlog2.f32 %v866_v56  ;;  %v1326_v59 = vpop.eup %1325  ;;  %930 = vst [vmem:[%s1758_s6 + $0x8] sm:$0xff] %v914_v57  ;;  %v896_v61 = vmul.f32 0.6931472, %v1324_v58 }
 0x4c8   :  { %v882_v62 = vmul.f32 0.6931472, %v1326_v59 }
 0x4c9   :  { %v872_v63 = vpop.xlane.xlu1 %871  ;;  %v858_v1 = vpop.xlane.xlu0 %857  ;;  %v920_v3 = vsub.f32 %v1636_v27, %v896_v61 }
 0x4ca   :  { %1339 = vlog2.f32 %v872_v63  ;;  %v1328_v4 = vpop.eup %1327  ;;  %v913_v20 = vsub.f32 %v1644_v34, %v882_v62 }
 0x4cb   :  { %1341 = vlog2.f32 %v858_v1  ;;  %v1330_v28 = vpop.eup %1329  ;;  %936 = vst [vmem:[%s1758_s6 + $0x38] sm:$0xff] %v920_v3  ;;  %v888_v39 = vmul.f32 0.6931472, %v1328_v4 }
 0x4cc   :  { %929 = vst [vmem:[%s1758_s6] sm:$0xff] %v913_v20  ;;  %v894_v41 = vmul.f32 0.6931472, %v1330_v28 }
 0x4cd   :  { %v876_v42 = vpop.xlane.xlu1 %875  ;;  %v870_v46 = vpop.xlane.xlu0 %869  ;;  %v916_v27 = vsub.f32 %v1642_v33, %v888_v39 }
 0x4ce   :  { %1343 = vlog2.f32 %v876_v42  ;;  %v919_v34 = vsub.f32 %v1648_v44, %v894_v41 }
 0x4cf   :  { %v1332_v43 = vpop.eup %1331  ;;  %1345 = vlog2.f32 %v870_v46  ;;  %932 = vst [vmem:[%s1758_s6 + $0x18] sm:$0xff] %v916_v27 }
 0x4d0   :  { %v1334_v47 = vpop.eup %1333  ;;  %v900_v48 = vmul.f32 0.6931472, %v1332_v43  ;;  %935 = vst [vmem:[%s1758_s6 + $0x30] sm:$0xff] %v919_v34 }
 0x4d1   :  { %v886_v50 = vmul.f32 0.6931472, %v1334_v47  ;;  %v880_v51 = vpop.xlane.xlu1 %879  ;;  %v874_v5 = vpop.xlane.xlu0 %873 }
 0x4d2   :  { %v922_v33 = vsub.f32 %v1650_v55, %v900_v48  ;;  %1347 = vlog2.f32 %v880_v51 }
 0x4d3   :  { %v1336_v53 = vpop.eup %1335  ;;  %v915_v44 = vsub.f32 %v1653_v54, %v886_v50  ;;  %1349 = vlog2.f32 %v874_v5 }
 0x4d4   :  { %v1338_v6 = vpop.eup %1337  ;;  %938 = vst [vmem:[%s1758_s6 + $0x48] sm:$0xff] %v922_v33  ;;  %v892_v7 = vmul.f32 0.6931472, %v1336_v53 }
 0x4d5   :  { %931 = vst [vmem:[%s1758_s6 + $0x10] sm:$0xff] %v915_v44  ;;  %v898_v9 = vmul.f32 0.6931472, %v1338_v6  ;;  %v878_v10 = vpop.xlane.xlu0 %877 }
 0x4d6   :  { %v918_v12 = vsub.f32 %v1659_v0, %v892_v7  ;;  %1351 = vlog2.f32 %v878_v10 }
 0x4d7   :  { %v1340_v55 = vpop.eup %1339  ;;  %v921_v13 = vsub.f32 %v1656_v60, %v898_v9 }
 0x4d8   :  { %v1342_v54 = vpop.eup %1341  ;;  %934 = vst [vmem:[%s1758_s6 + $0x28] sm:$0xff] %v918_v12  ;;  %v904_v14 = vmul.f32 0.6931472, %v1340_v55 }
 0x4d9   :  { %937 = vst [vmem:[%s1758_s6 + $0x40] sm:$0xff] %v921_v13  ;;  %v890_v15 = vmul.f32 0.6931472, %v1342_v54 }
 0x4da   :  { %v924_v16 = vsub.f32 %v1665_v40, %v904_v14 }
 0x4db   :  { %v1344_v17 = vpop.eup %1343  ;;  %v917_v0 = vsub.f32 %v1662_v2, %v890_v15 }
 0x4dc   :  { %v1346_v18 = vpop.eup %1345  ;;  %940 = vst [vmem:[%s1758_s6 + $0x58] sm:$0xff] %v924_v16  ;;  %v908_v60 = vmul.f32 0.6931472, %v1344_v17 }
 0x4dd   :  { %933 = vst [vmem:[%s1758_s6 + $0x20] sm:$0xff] %v917_v0  ;;  %v902_v19 = vmul.f32 0.6931472, %v1346_v18 }
 0x4de   :  { %v926_v21 = vsub.f32 %v1672_v49, %v908_v60 }
 0x4df   :  { %v1348_v22 = vpop.eup %1347  ;;  %v923_v23 = vsub.f32 %v1668_v45, %v902_v19 }
 0x4e0   :  { %v1350_v40 = vpop.eup %1349  ;;  %942 = vst [vmem:[%s1758_s6 + $0x68] sm:$0xff] %v926_v21  ;;  %v912_v2 = vmul.f32 0.6931472, %v1348_v22 }
 0x4e1   :  { %939 = vst [vmem:[%s1758_s6 + $0x50] sm:$0xff] %v923_v23  ;;  %v906_v24 = vmul.f32 0.6931472, %v1350_v40 }
 0x4e2   :  { %v928_v25 = vsub.f32 %v1680_v8, %v912_v2 }
 0x4e3   :  { %v1352_v26 = vpop.eup %1351  ;;  %v925_v29 = vsub.f32 %v1676_v52, %v906_v24 }
 0x4e4   :  { %944 = vst [vmem:[%s1758_s6 + $0x78] sm:$0xff] %v928_v25  ;;  %v910_v45 = vmul.f32 0.6931472, %v1352_v26 }
 0x4e5   :  { %941 = vst [vmem:[%s1758_s6 + $0x60] sm:$0xff] %v925_v29 }
 0x4e6   :  { %v927_v49 = vsub.f32 %v1684_v11, %v910_v45 }
 0x4e8   :  { %943 = vst [vmem:[%s1758_s6 + $0x70] sm:$0xff] %v927_v49 }

</bundles_post_ra>
